<compile_context>
chip_gen: v5e
topology: v5e:2x2
jax: 0.10.0
libtpu: 0.0.40
codegen_flags: <defaults>
</compile_context>

<pallas_src>
import math
import functools

import jax
import jax.numpy as jnp
from jax.experimental import pallas as pl
from jax.experimental.pallas import tpu as pltpu

_GELU_C = math.sqrt(2.0 / math.pi)


def _new_gelu(h):
    # NewGELU (tanh approximation), exactly the PyTorch formula.
    return 0.5 * h * (1.0 + jnp.tanh(_GELU_C * (h + 0.044715 * (h * h * h))))


def _mlp_kernel(x_ref, w1_ref, b1_ref, w2_ref, b2_ref, o_ref, acc_ref, *,
                gelu_dtype):
    # x_ref : [tm, D]   w1_ref: [D, tf]   b1_ref: [1, tf] (f32)
    # w2_ref: [tf, D]   b2_ref: [1, D]    o_ref : [tm, D]
    # acc_ref: [tm, D] f32 scratch, resident across the F-chunk axis.
    f = pl.program_id(1)
    nf = pl.num_programs(1)

    @pl.when(f == 0)
    def _init():
        acc_ref[...] = jnp.zeros_like(acc_ref)

    # In-kernel cast of the activation tile (VPU filler under MXU work).
    x = x_ref[...].astype(w1_ref.dtype)

    # c_fc chunk: bf16 operands on the MXU, f32 accumulation; bias add in f32.
    h = jnp.dot(x, w1_ref[...], preferred_element_type=jnp.float32)
    h = h + b1_ref[...]

    # NewGELU: bf16 on v6e/v7x (bf16 VPU/EUP), f32 on v5e.
    g = _new_gelu(h.astype(gelu_dtype))

    # c_proj chunk: accumulate in f32 across the F chunks.
    acc_ref[...] += jnp.dot(g.astype(w2_ref.dtype), w2_ref[...],
                            preferred_element_type=jnp.float32)

    @pl.when(f == nf - 1)
    def _finalize():
        o_ref[...] = (acc_ref[...] + b2_ref[...]).astype(o_ref.dtype)


def _vmem_budget_bytes():
    """~85% of physical VMEM: ~110 MiB on v5e/v6e, ~54 MiB on v7x."""
    cap = None
    try:
        cap = getattr(pltpu.get_tpu_info(), "vmem_capacity_bytes", None)
    except Exception:
        cap = None
    if not cap:
        cap = 128 * 1024 * 1024
    return int(cap * 0.85)


def _default_gelu_dtype():
    """bf16 elementwise math only on chips with bf16 VPU/EUP (v6e/v7x)."""
    try:
        kind = jax.devices()[0].device_kind.lower()
    except Exception:
        kind = ""
    if "v6" in kind or "v7" in kind:
        return jnp.bfloat16
    return jnp.float32


def _pick_tm(M, block_m):
    """Token tile: full M when small, else a multiple-of-8 divisor of M."""
    if M <= block_m:
        return M
    t = (block_m // 8) * 8
    while t >= 8:
        if M % t == 0:
            return t
        t -= 8
    return max((block_m // 8) * 8, 8)   # no divisor -> padding path


def _pick_tf(F, block_f):
    """Hidden-dim chunk: a multiple-of-128 divisor of F, else whole F."""
    if F <= block_f:
        return F
    t = (block_f // 128) * 128
    while t >= 128:
        if F % t == 0:
            return t
        t -= 128
    return F


def mlp_pallas(x, w1, b1, w2, b2, *, block_m=512, block_f=1024,
               matmul_dtype=jnp.bfloat16, gelu_dtype=None, out_dtype=None):
    """ViT MLP forward.

    x : [B, S, D]; w1: [D, F]; b1: [F]; w2: [F, D]; b2: [D]  ->  [B, S, D]
    (w1/w2 are the transposed nn.Linear weights.)
    """
    B, S, D = x.shape
    F = w1.shape[1]
    M = B * S
    out_dtype = x.dtype if out_dtype is None else out_dtype
    gelu_dtype = _default_gelu_dtype() if gelu_dtype is None else gelu_dtype

    # x stays in its native dtype; the bf16 cast happens inside the kernel.
    x2d = x.reshape(M, D)
    w1m = w1.astype(matmul_dtype)
    w2m = w2.astype(matmul_dtype)
    b1_2d = b1.reshape(1, F).astype(jnp.float32)
    b2_2d = b2.reshape(1, D).astype(jnp.float32)

    x_bytes = jnp.dtype(x2d.dtype).itemsize
    w_bytes = jnp.dtype(matmul_dtype).itemsize
    g_bytes = jnp.dtype(gelu_dtype).itemsize
    out_bytes = jnp.dtype(out_dtype).itemsize

    budget = _vmem_budget_bytes()

    def _estimate(tm, tf, nf):
        nbuf_w = 1 if nf == 1 else 2                    # Buffered(1) when resident
        return (2 * tm * D * x_bytes                    # x tiles (double-buffered)
                + 2 * tm * D * out_bytes                # out tiles
                + tm * D * 4                            # f32 accumulator scratch
                + nbuf_w * 2 * D * tf * w_bytes         # W1 + W2 chunks
                + nbuf_w * tf * 4 + D * 4               # biases
                + tm * tf * (4 + g_bytes + w_bytes))    # h (f32) + g + cast copy

    tm = _pick_tm(M, block_m)
    tf = _pick_tf(F, block_f)
    nf = pl.cdiv(F, tf)
    # Shrink the working set (tf first, then the token tile) to fit the budget
    # instead of silently clamping the VMEM limit.
    while _estimate(tm, tf, nf) > budget:
        if tf > 128 and tf % 256 == 0:
            tf //= 2
        elif block_m > 64:
            block_m //= 2
            tm = _pick_tm(M, block_m)
        else:
            break
        nf = pl.cdiv(F, tf)

    n_m = pl.cdiv(M, tm)
    M_pad = n_m * tm
    if M_pad != M:
        # TODO(synk): rely on partial-block masking instead of this pad copy once
        # odd-M lowering is verified on all generations.
        x2d = jnp.pad(x2d, ((0, M_pad - M), (0, 0)))

    # Constant-index specs: single-buffered (no benefit from double-buffering).
    if nf == 1:
        w1_spec = pl.BlockSpec((D, tf), lambda i, f: (0, 0),
                               pipeline_mode=pl.Buffered(1))
        b1_spec = pl.BlockSpec((1, tf), lambda i, f: (0, 0),
                               pipeline_mode=pl.Buffered(1))
        w2_spec = pl.BlockSpec((tf, D), lambda i, f: (0, 0),
                               pipeline_mode=pl.Buffered(1))
    else:
        w1_spec = pl.BlockSpec((D, tf), lambda i, f: (0, f))
        b1_spec = pl.BlockSpec((1, tf), lambda i, f: (0, f))
        w2_spec = pl.BlockSpec((tf, D), lambda i, f: (f, 0))
    b2_spec = pl.BlockSpec((1, D), lambda i, f: (0, 0),
                           pipeline_mode=pl.Buffered(1))

    weight_passes = 1 if nf == 1 else n_m   # weights re-streamed per token tile
    cost = pl.CostEstimate(
        flops=4 * M_pad * D * F,                       # two matmuls, 2*M*D*F each
        transcendentals=M_pad * F,                     # tanh per hidden element
        bytes_accessed=(M_pad * D * x_bytes
                        + weight_passes * 2 * D * F * w_bytes
                        + (F + D) * 4
                        + M_pad * D * out_bytes),
    )

    kernel = functools.partial(_mlp_kernel, gelu_dtype=gelu_dtype)

    out2d = pl.pallas_call(
        kernel,
        out_shape=jax.ShapeDtypeStruct((M_pad, D), out_dtype),
        grid_spec=pltpu.PrefetchScalarGridSpec(
            num_scalar_prefetch=0,
            grid=(n_m, nf),
            in_specs=[
                pl.BlockSpec((tm, D), lambda i, f: (i, 0)),  # x: tiled over tokens
                w1_spec, b1_spec, w2_spec, b2_spec,
            ],
            out_specs=pl.BlockSpec((tm, D), lambda i, f: (i, 0)),
            scratch_shapes=[pltpu.VMEM((tm, D), jnp.float32)],
        ),
        compiler_params=pltpu.CompilerParams(
            dimension_semantics=("parallel", "arbitrary"),
            vmem_limit_bytes=int(budget),
        ),
        cost_estimate=cost,
    )(x2d, w1m, b1_2d, w2m, b2_2d)

    if M_pad != M:
        out2d = out2d[:M]
    return out2d.reshape(B, S, D)


def mlp_reference_f32(x, w1, b1, w2, b2):
    """Pure-f32 JAX reference matching the PyTorch module exactly."""
    h = jnp.einsum("bsd,df->bsf", x, w1) + b1
    g = _new_gelu(h)
    return jnp.einsum("bsf,fd->bsd", g, w2) + b2


def mlp_reference_mixed(x, w1, b1, w2, b2, matmul_dtype=jnp.bfloat16,
                        gelu_dtype=jnp.float32):
    """Reference mirroring the kernel's mixed-precision math."""
    xb, w1b, w2b = (t.astype(matmul_dtype) for t in (x, w1, w2))
    h = jnp.einsum("bsd,df->bsf", xb, w1b,
                   preferred_element_type=jnp.float32) + b1
    g = _new_gelu(h.astype(gelu_dtype))
    out = jnp.einsum("bsf,fd->bsd", g.astype(matmul_dtype), w2b,
                     preferred_element_type=jnp.float32) + b2
    return out.astype(x.dtype)


if __name__ == "__main__":
    # Grid-exercising config: M = 2*48 = 96 tokens with a 64-token budget ->
    # tm = 48 (divisor of M, no pad), 2 token tiles; F = 512 with block_f=256
    # -> 2 F chunks, exercising the accumulator init/finalize path.
    B, S, D, F = 2, 48, 128, 512

    key = jax.random.PRNGKey(0)
    kx, kw1, kb1, kw2, kb2 = jax.random.split(key, 5)

    x = jax.random.normal(kx, (B, S, D), dtype=jnp.float32)

    # PyTorch nn.Linear stores weight as (out_features, in_features);
    # initialize in that convention and transpose for the kernel.
    w1_pt = jax.random.normal(kw1, (F, D), dtype=jnp.float32) * (1.0 / math.sqrt(D))
    b1 = jax.random.normal(kb1, (F,), dtype=jnp.float32) * 0.01
    w2_pt = jax.random.normal(kw2, (D, F), dtype=jnp.float32) * (1.0 / math.sqrt(F))
    b2 = jax.random.normal(kb2, (D,), dtype=jnp.float32) * 0.01

    w1 = w1_pt.T  # [D, F]
    w2 = w2_pt.T  # [F, D]

    gelu_dtype = _default_gelu_dtype()

    out = mlp_pallas(x, w1, b1, w2, b2, block_m=64, block_f=256,
                     gelu_dtype=gelu_dtype)
    out = jax.block_until_ready(out)
    assert out.shape == (B, S, D)

    # Strict check against a reference with identical mixed precision
    # (bf16 matmul operands, f32 accumulation, generation-matched GELU dtype).
    ref_mixed = mlp_reference_mixed(x, w1, b1, w2, b2, gelu_dtype=gelu_dtype)
    assert jnp.allclose(out, ref_mixed, atol=5e-3, rtol=5e-3), (
        "mismatch vs mixed-precision reference")

    # Loose sanity check against the exact full-f32 PyTorch-semantics reference
    # (difference is only bf16 rounding of matmul operands / GELU dtype).
    ref_f32 = mlp_reference_f32(x, w1, b1, w2, b2)
    assert jnp.allclose(out, ref_f32, atol=1e-1, rtol=1e-1), (
        "mismatch vs f32 reference")

    print("KERNEL_OK")
</pallas_src>

<mosaic_0001>
module attributes {stable_mosaic.version = 11 : i64} {
  func.func @_mlp_kernel(%arg0: i32, %arg1: i32, %arg2: memref<48x128xf32, #tpu.memory_space<vmem>>, %arg3: memref<128x256xbf16, #tpu.memory_space<vmem>>, %arg4: memref<1x256xf32, #tpu.memory_space<vmem>>, %arg5: memref<256x128xbf16, #tpu.memory_space<vmem>>, %arg6: memref<1x128xf32, #tpu.memory_space<vmem>>, %arg7: memref<48x128xf32, #tpu.memory_space<vmem>>, %arg8: memref<48x128xf32, #tpu.memory_space<vmem>>) attributes {dimension_semantics = [#tpu.dimension_semantics<parallel>, #tpu.dimension_semantics<arbitrary>], iteration_bounds = array<i64: 2, 2>, scalar_prefetch = 0 : i64, scratch_operands = 1 : i64, tpu.core_type = #tpu.core_type<tc>, window_params = [{transform_indices = @transform_0, window_bounds = array<i64: 48, 128>}, {transform_indices = @transform_1, window_bounds = array<i64: 128, 256>}, {transform_indices = @transform_2, window_bounds = array<i64: 1, 256>}, {transform_indices = @transform_3, window_bounds = array<i64: 256, 128>}, {pipeline_mode = #tpu.pipeline_mode<synchronous>, transform_indices = @transform_4, window_bounds = array<i64: 1, 128>}, {transform_indices = @transform_5, window_bounds = array<i64: 48, 128>}]} {
    %c0_i32 = arith.constant 0 : i32
    %0 = arith.cmpi eq, %arg1, %c0_i32 : i32
    %1 = arith.extui %0 : i1 to i32
    %c0_i32_0 = arith.constant 0 : i32
    %2 = arith.cmpi ne, %1, %c0_i32_0 : i32
    scf.if %2 {
      %cst_18 = arith.constant 0.000000e+00 : f32
      %32 = vector.broadcast %cst_18 : f32 to vector<48x128xf32>
      %c0_19 = arith.constant 0 : index
      %c0_20 = arith.constant 0 : index
      %33 = vector.load %arg8[%c0_19, %c0_20] : memref<48x128xf32, #tpu.memory_space<vmem>>, vector<48x128xf32>
      tpu.vector_store %arg8[%c0_19, %c0_20], %32 {strides = array<i32>} : memref<48x128xf32, #tpu.memory_space<vmem>>, vector<48x128xf32>,
    } else {
    }
    %c0 = arith.constant 0 : index
    %c0_1 = arith.constant 0 : index
    %3 = vector.load %arg2[%c0, %c0_1] : memref<48x128xf32, #tpu.memory_space<vmem>>, vector<48x128xf32>
    %4 = arith.truncf %3 : vector<48x128xf32> to vector<48x128xbf16>
    %c0_2 = arith.constant 0 : index
    %c0_3 = arith.constant 0 : index
    %5 = vector.load %arg3[%c0_2, %c0_3] : memref<128x256xbf16, #tpu.memory_space<vmem>>, vector<128x256xbf16>
    %cst = arith.constant dense<0.000000e+00> : vector<48x256xf32>
    %6 = tpu.matmul %4, %5, %cst {dimension_numbers = #tpu.dot_dimension_numbers<[1], [0], [0], [1], [0, 0, 1, 1], [], []>} : vector<48x128xbf16>, vector<128x256xbf16>, vector<48x256xf32> -> vector<48x256xf32>
    %c0_4 = arith.constant 0 : index
    %c0_5 = arith.constant 0 : index
    %7 = vector.load %arg4[%c0_4, %c0_5] : memref<1x256xf32, #tpu.memory_space<vmem>>, vector<1x256xf32>
    %8 = vector.broadcast %7 : vector<1x256xf32> to vector<48x256xf32>
    %9 = arith.addf %6, %8 : vector<48x256xf32>
    %cst_6 = arith.constant 5.000000e-01 : f32
    %10 = vector.broadcast %cst_6 : f32 to vector<48x256xf32>
    %11 = arith.mulf %10, %9 : vector<48x256xf32>
    %12 = arith.mulf %9, %9 : vector<48x256xf32>
    %13 = arith.mulf %12, %9 : vector<48x256xf32>
    %cst_7 = arith.constant 4.471500e-02 : f32
    %14 = vector.broadcast %cst_7 : f32 to vector<48x256xf32>
    %15 = arith.mulf %14, %13 : vector<48x256xf32>
    %16 = arith.addf %9, %15 : vector<48x256xf32>
    %cst_8 = arith.constant 0.797884583 : f32
    %17 = vector.broadcast %cst_8 : f32 to vector<48x256xf32>
    %18 = arith.mulf %17, %16 : vector<48x256xf32>
    %19 = math.tanh %18 : vector<48x256xf32>
    %cst_9 = arith.constant 1.000000e+00 : f32
    %20 = vector.broadcast %cst_9 : f32 to vector<48x256xf32>
    %21 = arith.addf %20, %19 : vector<48x256xf32>
    %22 = arith.mulf %11, %21 : vector<48x256xf32>
    %c0_10 = arith.constant 0 : index
    %c0_11 = arith.constant 0 : index
    %23 = vector.load %arg8[%c0_10, %c0_11] : memref<48x128xf32, #tpu.memory_space<vmem>>, vector<48x128xf32>
    %24 = arith.truncf %22 : vector<48x256xf32> to vector<48x256xbf16>
    %c0_12 = arith.constant 0 : index
    %c0_13 = arith.constant 0 : index
    %25 = vector.load %arg5[%c0_12, %c0_13] : memref<256x128xbf16, #tpu.memory_space<vmem>>, vector<256x128xbf16>
    %cst_14 = arith.constant dense<0.000000e+00> : vector<48x128xf32>
    %26 = tpu.matmul %24, %25, %cst_14 {dimension_numbers = #tpu.dot_dimension_numbers<[1], [0], [0], [1], [0, 0, 1, 1], [], []>} : vector<48x256xbf16>, vector<256x128xbf16>, vector<48x128xf32> -> vector<48x128xf32>
    %27 = arith.addf %23, %26 : vector<48x128xf32>
    %c0_15 = arith.constant 0 : index
    %c0_16 = arith.constant 0 : index
    %28 = vector.load %arg8[%c0_15, %c0_16] : memref<48x128xf32, #tpu.memory_space<vmem>>, vector<48x128xf32>
    tpu.vector_store %arg8[%c0_15, %c0_16], %27 {strides = array<i32>} : memref<48x128xf32, #tpu.memory_space<vmem>>, vector<48x128xf32>,
    %c1_i32 = arith.constant 1 : i32
    %29 = arith.cmpi eq, %arg1, %c1_i32 : i32
    %30 = arith.extui %29 : i1 to i32
    %c0_i32_17 = arith.constant 0 : i32
    %31 = arith.cmpi ne, %30, %c0_i32_17 : i32
    scf.if %31 {
      %c0_18 = arith.constant 0 : index
      %c0_19 = arith.constant 0 : index
      %32 = vector.load %arg8[%c0_18, %c0_19] : memref<48x128xf32, #tpu.memory_space<vmem>>, vector<48x128xf32>
      %c0_20 = arith.constant 0 : index
      %c0_21 = arith.constant 0 : index
      %33 = vector.load %arg6[%c0_20, %c0_21] : memref<1x128xf32, #tpu.memory_space<vmem>>, vector<1x128xf32>
      %34 = vector.broadcast %33 : vector<1x128xf32> to vector<48x128xf32>
      %35 = arith.addf %32, %34 : vector<48x128xf32>
      %c0_22 = arith.constant 0 : index
      %c0_23 = arith.constant 0 : index
      %36 = vector.load %arg7[%c0_22, %c0_23] : memref<48x128xf32, #tpu.memory_space<vmem>>, vector<48x128xf32>
      tpu.vector_store %arg7[%c0_22, %c0_23], %35 {strides = array<i32>} : memref<48x128xf32, #tpu.memory_space<vmem>>, vector<48x128xf32>,
    } else {
    }
    return
  }
  func.func @transform_0(%arg0: i32, %arg1: i32) -> (i32, i32) {
    %c0_i32 = arith.constant 0 : i32
    %c0_i32_0 = arith.constant 0 : i32
    return %arg0, %c0_i32 : i32, i32
  }
  func.func @transform_1(%arg0: i32, %arg1: i32) -> (i32, i32) {
    %c0_i32 = arith.constant 0 : i32
    %c0_i32_0 = arith.constant 0 : i32
    return %c0_i32, %arg1 : i32, i32
  }
  func.func @transform_2(%arg0: i32, %arg1: i32) -> (i32, i32) {
    %c0_i32 = arith.constant 0 : i32
    %c0_i32_0 = arith.constant 0 : i32
    return %c0_i32, %arg1 : i32, i32
  }
  func.func @transform_3(%arg0: i32, %arg1: i32) -> (i32, i32) {
    %c0_i32 = arith.constant 0 : i32
    %c0_i32_0 = arith.constant 0 : i32
    return %arg1, %c0_i32 : i32, i32
  }
  func.func @transform_4(%arg0: i32, %arg1: i32) -> (i32, i32) {
    %c0_i32 = arith.constant 0 : i32
    %c0_i32_0 = arith.constant 0 : i32
    %c0_i32_1 = arith.constant 0 : i32
    return %c0_i32, %c0_i32_0 : i32, i32
  }
  func.func @transform_5(%arg0: i32, %arg1: i32) -> (i32, i32) {
    %c0_i32 = arith.constant 0 : i32
    %c0_i32_0 = arith.constant 0 : i32
    return %arg0, %c0_i32 : i32, i32
  }
}

</mosaic_0001>

<bundles_post_ra>
// kernel: tpu_custom_call.1
= control target key start
LH: loop header
LB: loop body
LE: loop exit
PB: predicated region body
PF: predicated region fallthrough
CT: control target
= control target key end

     0   :  { %s2077_s0 = inlined_call_operand.hbm [shape: f32[96,128], index: 0, kind: input, shape index: {}]   ;;  %s2078_s1 = inlined_call_operand.hbm [shape: bf16[128,512], index: 1, kind: input, shape index: {}]   ;;  %s2079_s2 = inlined_call_operand.hbm [shape: f32[1,512], index: 2, kind: input, shape index: {}]   ;;  %s2080_s3 = inlined_call_operand.hbm [shape: bf16[512,128], index: 3, kind: input, shape index: {}]   ;;  %s2081_s4 = inlined_call_operand.vmem [shape: f32[1,128], index: 4, kind: input, shape index: {}]   ;;  %s2082_s5 = inlined_call_operand.hbm [shape: f32[96,128], index: 5, kind: output, shape index: {}]  }
   0x1   :  { %2099 = sst [smem:[#allocation28_spill]] %s2077_s0 }
   0x2   :  { %2100 = sst [smem:[#allocation29_spill]] %s2078_s1 }
   0x3   :  { %2101 = sst [smem:[#allocation30_spill]] %s2082_s5 }
   0x4   :  { %10 = vsyncpa [#allocation4], 0 }
   0x5   :  { %12 = vsyncpa [#allocation4 + $0x1], 0 }
   0x6   :  { %13 = vsyncpa [#allocation7], 0 }
   0x7   :  { %15 = vsyncpa [#allocation7 + $0x1], 0 }
   0x8   :  { %16 = vsyncpa [#allocation10], 0 }
   0x9   :  { %18 = vsyncpa [#allocation10 + $0x1], 0 }
   0xa   :  { %19 = vsyncpa [#allocation5], 0 }
   0xb   :  { %21 = vsyncpa [#allocation5 + $0x1], 0  ;;  %s1679_s18 = smov 0   ;;  %s1681_s19 = smov 0  }
   0xc   :  { %s1683_s20 = smov 0   ;;  %s1685_s21 = smov 0  }
   0xd   :  { %s1687_s22 = smov 0   ;;  %s1689_s23 = smov 0  }
   0xe   :  { %s1691_s24 = smov 0   ;;  %s1693_s25 = smov 0  }
   0xf   :  { %s1695_s26 = smov 0   ;;  %s1697_s27 = smov 0  }
  0x10   :  { %s1699_s28 = smov 0  }
  0x11 LB: > { %2102 = sst [smem:[#allocation16_spill]] %s1607_s20  ;;  %p54_p0 = scmp.eq.s32.totalorder %s1639_s28, 0  ;;  %s1639_s28 = sphi %s1699_s28, %s27_s28   ;;  %s1635_s27 = sphi %s1697_s27, %s2148_s27   ;;  %s1631_s26 = sphi %s1695_s26, %s2147_s26   ;;  %s1627_s25 = sphi %s1693_s25, %s2139_s25   ;;  %s1623_s24 = sphi %s1691_s24, %s2146_s24   ;;  %s1619_s23 = sphi %s1689_s23, %s2138_s23   ;;  %s1615_s22 = sphi %s1687_s22, %s2145_s22   ;;  %s1611_s21 = sphi %s1685_s21, %s2144_s21   ;;  %s1607_s20 = sphi %s1683_s20, %s2136_s20   ;;  %s1603_s19 = sphi %s1681_s19, %s2143_s19   ;;  %s1599_s18 = sphi %s1679_s18, %s2142_s18  }
  0x12   : > { %2103 = sst [smem:[#allocation17_spill]] %s1611_s21  ;;  %p79_p1 = scmp.ne.s32.totalorder %s1607_s20, %s1603_s19 }
  0x13   : > { %2104 = sst [smem:[#allocation18_spill]] %s1619_s23  ;;  %p85_p2 = scmp.ne.s32.totalorder %s1603_s19, %s1599_s18 }
  0x14   : > { %2105 = sst [smem:[#allocation19_spill]] %s1627_s25  ;;  %p2087_p3 = scmp.lt.s32.totalorder %s1639_s28, 4 }
  0x15   : > { %2106 = sst [smem:[#allocation20_spill]] %s1635_s27  ;;  %p81_p4 = por %p79_p1, %p54_p0 }
  0x16   : > { %2107 = sst [smem:[#allocation21_spill]] %s1639_s28  ;;  %s233_s30 = sand.u32 1, %s1639_s28  }
  0x17   : > { %s1745_s6 = sand.u32 1, %s1607_s20   ;;  %s1202_s8 = sshll.u32 %s1631_s26, 3 }
  0x18   : > { %s2083_s7 = sshll.u32 %s1745_s6, 7  ;;  %s2108_s1 = sld [smem:[#allocation29_spill]] }
  0x19   : > { %s237_s13 = scalar_lea.vmem [#allocation6], %s2083_s7  ;;  %p1756_p5 = pnand %p2087_p3, %p81_p4 }
  0x1a   : > { %s245_s14 = sshll.u32 %s237_s13, 4  ;;  %p1064_p6 = scmp.ge.s32.totalorder %s1639_s28, 1  ;;  %s246_s14 = int_to_ptr.vmem [resolvable:$true] %s245_s14 }
  0x1b   : > { %p294_p7 = scmp.lt.s32.totalorder %s1639_s28, 5  ;;  %s1762_s16 = scalar_lea.sflag [#allocation7], %s233_s30 }
  0x1c   : > { %s1641_s17 = smov 256   ;;  %s2085_s9 = smov 8  }
  0x1d   : > { %p1769_p8 = pnand %p1064_p6, %p294_p7  ;;  %s1774_s30 = sadd.s32 4294967295, %s1639_s28  }
  0x1e   : > { %s242_s11 = scalar_lea.hbm %s2108_s1, %s1202_s8  ;;  %s2084_s8 = smov 128  }
  0x1f   : > { %s243_s12 = sshll.u32 %s242_s11, 4  ;;  %s1052_s11 = sadd.s32 4294967294, %s1639_s28   ;;  %s244_s12 = int_to_ptr.hbm [resolvable:$true] %s243_s12 }
  0x20   : > { %1255 = dma.hbm_to_vmem [thread:$0]  (!%p1756_p5), %s244_s12, 2048, %s246_s14, %s1762_s16, %s1641_s17, %s2084_s8, %s2085_s9  }
  0x21   : > { %s36_s13 = sadd.s32 1, %s1631_s26  ;;  %s39_s7 = sadd.s32 1, %s1635_s27 }
  0x22   : > { %p37_p9 = scmp.ge.s32.totalorder %s36_s13, 2  ;;  %s46_s29 = sadd.s32 1, %s1619_s23 }
  0x23   : > { %p53_p10 = scmp.ne.s32.totalorder %s1619_s23, %s1615_s22  ;;  %p59_p11 = scmp.ne.s32.totalorder %s1615_s22, %s1611_s21 }
  0x24   : > { %s2150_s13 = smov (%p37_p9, %s36_s13), 0  ;;  %s2152_s7 = smov (!%p37_p9, %s39_s7), %s1635_s27 }
  0x25   : > { %2111 = sst [smem:[#allocation22_spill]] %s2150_s13  ;;  %p1792_p12 = por %p54_p0, %p53_p10 }
  0x26   : > { %p60_p13 = scmp.eq.s32.totalorder %s1774_s30, 0  ;;  %p41_p1 = scmp.ge.s32.totalorder %s2152_s7, 2 }
  0x27   : > { %s69_s14 = ssub.s32 %s1631_s26, %s2150_s13  ;;  %s2115_s8 = sadd.s32 1, %s1607_s20 }
  0x28   : > { %p1802_p4 = por %p60_p13, %p59_p11  ;;  %p70_p6 = scmp.eq.s32.totalorder %s69_s14, 0 }
  0x29   : > { %s2154_s7 = smov (%p41_p1, %s2152_s7), 0  ;;  %p1818_p0 = por %p85_p2, %p60_p13 }
  0x2a   : > { %2114 = sst [smem:[#allocation23_spill]] %s2154_s7  ;;  %s43_s1 = ssub.s32 %s1635_s27, %s2154_s7 }
  0x2b   : > { %s1811_s9 = scalar_select %p70_p6, %s1607_s20, %s2115_s8  }
  0x2c   : > { %p44_p7 = scmp.eq.s32.totalorder %s43_s1, 0  ;;  %p182_p9 = scmp.eq.s32.totalorder %s1774_s30, 3 }
  0x2d   : > { %2116 = sst [smem:[#allocation24_spill]] %s1811_s9  ;;  %p188_p3 = scmp.eq.s32.totalorder %s1052_s11, 3 }
  0x2e   : > { %s211_s13 = sand.u32 1, %s1619_s23   ;;  %p1830_p1 = por %p182_p9, %p53_p10 }
  0x2f   : > { %s1825_s25 = scalar_select %p44_p7, %s1619_s23, %s46_s29  }
  0x30   : > { %s2119_s14 = scalar_select %p1830_p1, 1, 0 }
  0x31   : > { %2118 = sst [smem:[#allocation25_spill]] %s1825_s25  ;;  %p1837_p6 = por %p188_p3, %p59_p11 }
  0x32   : > { %2120 = sst [smem:[#allocation26_spill]] %s2119_s14  ;;  %s1237_s18 = smul.u32 48, %s211_s13 }
  0x33   : > { %s2121_s8 = scalar_select %p1837_p6, 1, 0 }
  0x34   : > { %s1201_s7 = smul.u32 48, %s1635_s27  ;;  %p2123_p2 = scmp.lt.s32.totalorder %s1639_s28, 4 }
  0x35   : > { %2122 = sst [smem:[#allocation27_spill]] %s2121_s8  ;;  %s1059_s1 = sshll.u32 %s1745_s6, 1 }
  0x36   : > { %p1250_p13 = pnand %p2123_p2, %p1792_p12  ;;  %s2124_s0 = sld [smem:[#allocation28_spill]] }
  0x37   : > { %s215_s25 = scalar_lea.vmem [#allocation3], %s1237_s18  ;;  %s212_s8 = scalar_lea.sflag [#allocation4], %s211_s13 }
  0x38   : > { %s223_s23 = sshll.u32 %s215_s25, 4  ;;  %s2125_s21 = smov 8   ;;  %s224_s23 = int_to_ptr.vmem [resolvable:$true] %s223_s23 }
  0x39   : > { %s2126_s27 = smov 128   ;;  %s1060_s12 = sshll.u32 %s1631_s26, 1 }
  0x3a   : > { %s263_s9 = scalar_lea.hbm %s2079_s2, %s1060_s12  ;;  %s259_s11 = scalar_lea.vmem [#allocation8], %s1059_s1 }
  0x3b   : > { %s265_s18 = sshll.u32 %s263_s9, 4  ;;  %s1203_s25 = sshll.u32 %s1631_s26, 7  ;;  %s266_s18 = int_to_ptr.hbm [resolvable:$true] %s265_s18 }
  0x3c   : > { %s220_s29 = scalar_lea.hbm %s2124_s0, %s1201_s7  ;;  %s267_s7 = sshll.u32 %s259_s11, 4  ;;  %s268_s7 = int_to_ptr.vmem [resolvable:$true] %s267_s7 }
  0x3d   : > { %s221_s20 = sshll.u32 %s220_s29, 4  ;;  %s283_s0 = scalar_lea.hbm %s2080_s3, %s1203_s25  ;;  %s222_s20 = int_to_ptr.hbm [resolvable:$true] %s221_s20 }
  0x3e   : > { %1252 = dma.hbm_to_vmem [thread:$0]  (!%p1250_p13), %s222_s20, 768, %s224_s23, %s212_s8, %s2126_s27, %s2126_s27, %s2125_s21  }
  0x3f   : > { %1258 = dma.hbm_to_vmem [thread:$0]  (!%p1756_p5), %s266_s18, 32, %s268_s7, %s1762_s16  }
  0x40   : > { %s2127_s20 = sshll.u32 %s1745_s6, 7  ;;  %s284_s27 = sshll.u32 %s283_s0, 4  ;;  %s285_s27 = int_to_ptr.hbm [resolvable:$true] %s284_s27 }
  0x41   : > { %s278_s21 = scalar_lea.vmem [#allocation9], %s2127_s20  ;;  %s275_s28 = scalar_lea.sflag [#allocation10], %s1745_s6 }
  0x42   : > { %s286_s23 = sshll.u32 %s278_s21, 4  ;;  %s1644_s14 = smov 64   ;;  %s287_s23 = int_to_ptr.vmem [resolvable:$true] %s286_s23 }
  0x43   : > { %s1645_s8 = smov 4   ;;  %298 = sbr.rel (%p1769_p8) target bundleno = 499 (0x1f3), region = 40 }
  0x44   : > { %1261 = dma.hbm_to_vmem [thread:$0]  (!%p1756_p5), %s285_s27, 2048, %s287_s23, %s275_s28, %s1644_s14, %s1644_s14, %s1645_s8  }
  0x45   : > { %s1872_s16 = sand.u32 (!%p1769_p8), 1, %s1615_s22  }
  0x46   : > { %s1238_s1 = smul.u32 (!%p1769_p8), 48, %s1872_s16  ;;  %s301_s12 = scalar_lea.sflag (!%p1769_p8), [#allocation4], %s1872_s16 }
  0x48   : > { %s1876_s9 = scalar_lea.vmem [#allocation3], %s1238_s1 }
  0x49   : > { %1582 = dma.done.wait (%p1802_p4), %s301_s12, 768  }
  0x4a   : > { %1584 = vsyncadd (%p1802_p4), %s301_s12, 4294966528  ;;  %s310_s0 = sand.u32 1, %s1774_s30   ;;  %s312_s6 = sand.u32 1, %s1603_s19  }
  0x4b   : > { %s1065_s15 = sshll.u32 %s312_s6, 7  ;;  %s311_s10 = scalar_lea.sflag [#allocation7], %s310_s0 }
  0x4c   : > { %s1884_s11 = scalar_lea.vmem [#allocation6], %s1065_s15 }
  0x4d   : > { %1586 = dma.done.wait (%p1818_p0), %s311_s10, 2080  }
  0x4e   : > { %1588 = vsyncadd (%p1818_p0), %s311_s10, 4294965216  ;;  %s1066_s7 = sshll.u32 %s312_s6, 1  ;;  %s331_s17 = scalar_lea.sflag [#allocation10], %s312_s6 }
  0x4f   : > { %s1890_s18 = scalar_lea.vmem [#allocation8], %s1066_s7  ;;  %s1892_s25 = scalar_lea.vmem [#allocation9], %s1065_s15 }
  0x50   : > { %1590 = dma.done.wait (%p1818_p0), %s331_s17, 2048  }
  0x51   : > { %1592 = vsyncadd (%p1818_p0), %s331_s17, 4294965248  ;;  %s1898_s30 = scalar_lea.vmem [#allocation11], %s1238_s1  ;;  %p1068_p3 = scmp.ne.s32.totalorder %s1623_s24, 0 }
  0x53   : > { %385 = sbr.rel (%p1068_p3) target bundleno = 95 (0x5f), region = 60 }
  0x58   : > { %v1646_v0 = vmov 0.0  }
  0x59   : > { %386 = vst [vmem:[#allocation2 + $0x28] sm:$0xff] %v1646_v0 }
  0x5a   : > { %387 = vst [vmem:[#allocation2 + $0x10] sm:$0xff] %v1646_v0 }
  0x5b   : > { %388 = vst [vmem:[#allocation2 + $0x8] sm:$0xff] %v1646_v0 }
  0x5c   : > { %389 = vst [vmem:[#allocation2] sm:$0xff] %v1646_v0 }
  0x5d   : > { %390 = vst [vmem:[#allocation2 + $0x18] sm:$0xff] %v1646_v0 }
  0x5e   : > { %391 = vst [vmem:[#allocation2 + $0x20] sm:$0xff] %v1646_v0 }
  0x5f PF: > { %v1127_v1 = vld [vmem:[%s1884_s11 + $0x70] sm:$0xf]  ;;  %v1219_v2 = vld [vmem:[%s1884_s11 + $0x74] sm:$0xf0]  ;;  %v1218_v3 = vld [vmem:[%s1884_s11 + $0x74] sm:$0xf] }
  0x60   : > { %v1128_v4 = vor.u32 %v1219_v2, %v1127_v1  ;;  %v1129_v5 = vld [vmem:[%s1884_s11 + $0x78] sm:$0xf0]  ;;  %v1119_v6 = vld [vmem:[%s1884_s11 + $0x60] sm:$0xf]  ;;  %v1217_v7 = vld [vmem:[%s1884_s11 + $0x64] sm:$0xf0] }
  0x61   : > { %v1132_v8 = vor.u32 %v1218_v3, %v1129_v5  ;;  %v1216_v9 = vld [vmem:[%s1884_s11 + $0x64] sm:$0xf]  ;;  %v1121_v10 = vld [vmem:[%s1884_s11 + $0x68] sm:$0xf0]  ;;  %v1120_v11 = vor.u32 %v1217_v7, %v1119_v6  ;;  %v1111_v13 = vld [vmem:[%s1884_s11 + $0x50] sm:$0xf] }
  0x62   : > { %503 = vmatpush.bf16.msra.mxu0 %v1128_v4  ;;  %v1124_v12 = vor.u32 %v1216_v9, %v1121_v10  ;;  %v1215_v14 = vld [vmem:[%s1884_s11 + $0x54] sm:$0xf0]  ;;  %v1214_v15 = vld [vmem:[%s1884_s11 + $0x54] sm:$0xf]  ;;  %v1113_v16 = vld [vmem:[%s1884_s11 + $0x58] sm:$0xf0] }
  0x63   : > { %527 = vmatpush.bf16.msra.mxu1 %v1132_v8  ;;  %v1112_v17 = vor.u32 %v1215_v14, %v1111_v13  ;;  %v1116_v18 = vor.u32 %v1214_v15, %v1113_v16  ;;  %v1103_v19 = vld [vmem:[%s1884_s11 + $0x40] sm:$0xf]  ;;  %v1213_v20 = vld [vmem:[%s1884_s11 + $0x44] sm:$0xf0]  ;;  %v1212_v21 = vld [vmem:[%s1884_s11 + $0x44] sm:$0xf] }
  0x64   : > { %v1105_v22 = vld [vmem:[%s1884_s11 + $0x48] sm:$0xf0]  ;;  %v1104_v23 = vor.u32 %v1213_v20, %v1103_v19  ;;  %v1095_v25 = vld [vmem:[%s1884_s11 + $0x30] sm:$0xf]  ;;  %v1211_v26 = vld [vmem:[%s1884_s11 + $0x34] sm:$0xf0] }
  0x65   : > { %v1108_v24 = vor.u32 %v1212_v21, %v1105_v22  ;;  %v1210_v27 = vld [vmem:[%s1884_s11 + $0x34] sm:$0xf]  ;;  %v1097_v28 = vld [vmem:[%s1884_s11 + $0x38] sm:$0xf0]  ;;  %v1096_v29 = vor.u32 %v1211_v26, %v1095_v25  ;;  %v1087_v31 = vld [vmem:[%s1884_s11 + $0x20] sm:$0xf] }
  0x66   : > { %504 = vmatpush.bf16.msra.mxu0 %v1120_v11  ;;  %v1100_v30 = vor.u32 %v1210_v27, %v1097_v28  ;;  %v1209_v32 = vld [vmem:[%s1884_s11 + $0x24] sm:$0xf0]  ;;  %v1208_v33 = vld [vmem:[%s1884_s11 + $0x24] sm:$0xf]  ;;  %v1089_v34 = vld [vmem:[%s1884_s11 + $0x28] sm:$0xf0] }
  0x67   : > { %528 = vmatpush.bf16.msra.mxu1 %v1124_v12  ;;  %v1088_v35 = vor.u32 %v1209_v32, %v1087_v31  ;;  %v1092_v36 = vor.u32 %v1208_v33, %v1089_v34  ;;  %v1079_v37 = vld [vmem:[%s1884_s11 + $0x10] sm:$0xf]  ;;  %v1207_v38 = vld [vmem:[%s1884_s11 + $0x14] sm:$0xf0]  ;;  %v1206_v39 = vld [vmem:[%s1884_s11 + $0x14] sm:$0xf] }
  0x68   : > { %v1081_v40 = vld [vmem:[%s1884_s11 + $0x18] sm:$0xf0]  ;;  %v1080_v41 = vor.u32 %v1207_v38, %v1079_v37  ;;  %v1071_v43 = vld [vmem:[%s1884_s11] sm:$0xf]  ;;  %v1205_v44 = vld [vmem:[%s1884_s11 + $0x4] sm:$0xf0] }
  0x69   : > { %v1084_v42 = vor.u32 %v1206_v39, %v1081_v40  ;;  %v1204_v45 = vld [vmem:[%s1884_s11 + $0x4] sm:$0xf]  ;;  %v1073_v46 = vld [vmem:[%s1884_s11 + $0x8] sm:$0xf0]  ;;  %v1072_v47 = vor.u32 %v1205_v44, %v1071_v43  ;;  %v1227_v58 = vld [vmem:[%s1892_s25 + $0x38] sm:$0xff]  ;;  %p1197_p5 = scmp.ne.s32.totalorder %s1623_s24, 1 }
  0x6a   : > { %505 = vmatpush.bf16.msra.mxu0 %v1112_v17  ;;  %v392_v48 = vld [vmem:[%s1876_s9] sm:$0xff]  ;;  %v393_v49 = vld [vmem:[%s1876_s9 + $0x8] sm:$0xff]  ;;  %v1076_v50 = vor.u32 %v1204_v45, %v1073_v46  ;;  %v394_v52 = vld [vmem:[%s1876_s9 + $0x10] sm:$0xff]  ;;  %799 = vmatpush.bf16.msra.mxu2 %v1227_v58 }
  0x6b   : > { %529 = vmatpush.bf16.msra.mxu1 %v1116_v18  ;;  %v398_v51 = vpack.c.bf16 %v393_v49, %v392_v48  ;;  %v395_v53 = vld [vmem:[%s1876_s9 + $0x18] sm:$0xff]  ;;  %v396_v55 = vld [vmem:[%s1876_s9 + $0x20] sm:$0xff]  ;;  %v397_v56 = vld [vmem:[%s1876_s9 + $0x28] sm:$0xff] }
  0x6c   : > { %v399_v54 = vpack.c.bf16 %v395_v53, %v394_v52  ;;  %v400_v57 = vpack.c.bf16 %v397_v56, %v396_v55  ;;  %v1235_v59 = vld [vmem:[%s1892_s25 + $0x78] sm:$0xff]  ;;  %v1226_v60 = vld [vmem:[%s1892_s25 + $0x30] sm:$0xff]  ;;  %v1225_v62 = vld [vmem:[%s1892_s25 + $0x28] sm:$0xff] }
  0x6d   : > { %823 = vmatpush.bf16.msra.mxu3 %v1235_v59  ;;  %v1234_v61 = vld [vmem:[%s1892_s25 + $0x70] sm:$0xff]  ;;  %v1233_v63 = vld [vmem:[%s1892_s25 + $0x68] sm:$0xff]  ;;  %v1224_v0 = vld [vmem:[%s1892_s25 + $0x20] sm:$0xff] }
  0x6e   : > { %506 = vmatpush.bf16.msra.mxu0 %v1104_v23  ;;  %800 = vmatpush.bf16.msra.mxu2 %v1226_v60  ;;  %v1232_v1 = vld [vmem:[%s1892_s25 + $0x60] sm:$0xff]  ;;  %v1223_v2 = vld [vmem:[%s1892_s25 + $0x18] sm:$0xff]  ;;  %v1222_v4 = vld [vmem:[%s1892_s25 + $0x10] sm:$0xff] }
  0x6f   : > { %530 = vmatpush.bf16.msra.mxu1 %v1108_v24  ;;  %v1231_v3 = vld [vmem:[%s1892_s25 + $0x58] sm:$0xff]  ;;  %v1230_v5 = vld [vmem:[%s1892_s25 + $0x50] sm:$0xff]  ;;  %v1221_v7 = vld [vmem:[%s1892_s25 + $0x8] sm:$0xff] }
  0x70   : > { %v417_v6 = vld [vmem:[%s1890_s18] sm:$0x3]  ;;  %v1229_v8 = vld [vmem:[%s1892_s25 + $0x48] sm:$0xff]  ;;  %v1220_v11 = vld [vmem:[%s1892_s25] sm:$0xff] }
  0x71   : > { %824 = vmatpush.bf16.msra.mxu3 %v1234_v61  ;;  %v1954_v9 = vperm.slane %v417_v6, 0  ;;  %v1956_v10 = vperm.slane %v417_v6, 1  ;;  %v1228_v12 = vld [vmem:[%s1892_s25 + $0x40] sm:$0xff] }
  0x72   : > { %507 = vmatpush.bf16.msra.mxu0 %v1096_v29  ;;  %801 = vmatpush.bf16.msra.mxu2 %v1225_v62 }
  0x73   : > { %531 = vmatpush.bf16.msra.mxu1 %v1100_v30 }
  0x75   : > { %825 = vmatpush.bf16.msra.mxu3 %v1233_v63 }
  0x76   : > { %508 = vmatpush.bf16.msra.mxu0 %v1088_v35  ;;  %802 = vmatpush.bf16.msra.mxu2 %v1224_v0 }
  0x77   : > { %532 = vmatpush.bf16.msra.mxu1 %v1092_v36 }
  0x79   : > { %826 = vmatpush.bf16.msra.mxu3 %v1232_v1 }
  0x7a   : > { %509 = vmatpush.bf16.msra.mxu0 %v1080_v41  ;;  %803 = vmatpush.bf16.msra.mxu2 %v1223_v2 }
  0x7b   : > { %533 = vmatpush.bf16.msra.mxu1 %v1084_v42 }
  0x7d   : > { %827 = vmatpush.bf16.msra.mxu3 %v1231_v3 }
  0x7e   : > { %510 = vmatpush.bf16.msra.mxu0 %v1072_v47  ;;  %804 = vmatpush.bf16.msra.mxu2 %v1222_v4 }
  0x7f   : > { %534 = vmatpush.bf16.msra.mxu1 %v1076_v50 }
  0x81   : > { %511 = vmatmul.bf16.vlgmr.msra.gmra.mxu0 %v398_v51  ;;  %828 = vmatpush.bf16.msra.mxu3 %v1230_v5 }
  0x82   : > { %535 = vmatmul.bf16.vlgmr.msra.gmra.mxu1 %v398_v51  ;;  %805 = vmatpush.bf16.msra.mxu2 %v1221_v7 }
  0x85   : > { %829 = vmatpush.bf16.msra.mxu3 %v1229_v8 }
  0x86   : > { %806 = vmatpush.bf16.msra.mxu2 %v1220_v11 }
  0x89   : > { %830 = vmatpush.bf16.msra.mxu3 %v1228_v12 }
  0x91   : > { %516 = vmatmul.bf16.gmra.mxu0 %v399_v54 }
  0x92   : > { %540 = vmatmul.bf16.gmra.mxu1 %v399_v54 }
  0xa1   : > { %521 = vmatmul.bf16.gmra.mxu0 %v400_v57 }
  0xa2   : > { %545 = vmatmul.bf16.gmra.mxu1 %v400_v57 }
  0xfe   : > { %v512_v13 = vpop.f32.mrf.mxu0 }
  0xff   : > { %v513_v14 = vadd.f32 %v512_v13, %v1954_v9  ;;  %v536_v15 = vpop.f32.mrf.mxu1 }
 0x100   : > { %v537_v16 = vadd.f32 %v536_v15, %v1956_v10 }
 0x101   : > { %v563_v17 = vmul.f32 %v513_v14, %v513_v14  ;;  %v551_v62 = vmul.f32 0.5, %v513_v14 }
 0x102   : > { %v564_v18 = vmul.f32 %v537_v16, %v537_v16  ;;  %v552_v4 = vmul.f32 0.5, %v537_v16 }
 0x103   : > { %v575_v19 = vmul.f32 %v563_v17, %v513_v14 }
 0x104   : > { %v576_v20 = vmul.f32 %v564_v18, %v537_v16 }
 0x105   : > { %v587_v21 = vmul.f32 0.044715, %v575_v19 }
 0x106   : > { %v588_v22 = vmul.f32 0.044715, %v576_v20  ;;  %v514_v23 = vpop.f32.mrf.mxu0 }
 0x107   : > { %v515_v24 = vadd.f32 %v514_v23, %v1954_v9  ;;  %v538_v25 = vpop.f32.mrf.mxu1  ;;  %v599_v26 = vadd.f32 %v587_v21, %v513_v14 }
 0x108   : > { %v539_v27 = vadd.f32 %v538_v25, %v1956_v10  ;;  %v600_v28 = vadd.f32 %v588_v22, %v537_v16 }
 0x109   : > { %v565_v29 = vmul.f32 %v515_v24, %v515_v24  ;;  %v611_v32 = vmul.f32 0.7978846, %v599_v26  ;;  %v553_v2 = vmul.f32 0.5, %v515_v24 }
 0x10a   : > { %v566_v30 = vmul.f32 %v539_v27, %v539_v27  ;;  %v612_v34 = vmul.f32 0.7978846, %v600_v28  ;;  %v554_v6 = vmul.f32 0.5, %v539_v27 }
 0x10b   : > { %v577_v31 = vmul.f32 %v565_v29, %v515_v24  ;;  %1364 = vtanh.f32 %v611_v32 }
 0x10c   : > { %v578_v33 = vmul.f32 %v566_v30, %v539_v27  ;;  %1366 = vtanh.f32 %v612_v34 }
 0x10d   : > { %v589_v35 = vmul.f32 0.044715, %v577_v31 }
 0x10e   : > { %v590_v36 = vmul.f32 0.044715, %v578_v33  ;;  %v517_v37 = vpop.f32.mrf.mxu0 }
 0x10f   : > { %v1965_v38 = vadd.f32 %v517_v37, %v1954_v9  ;;  %v541_v39 = vpop.f32.mrf.mxu1  ;;  %v601_v40 = vadd.f32 %v589_v35, %v515_v24 }
 0x110   : > { %v1968_v41 = vadd.f32 %v541_v39, %v1956_v10  ;;  %v602_v42 = vadd.f32 %v590_v36, %v539_v27 }
 0x111   : > { %v567_v43 = vmul.f32 %v1965_v38, %v1965_v38  ;;  %v613_v44 = vmul.f32 0.7978846, %v601_v40  ;;  %v1365_v49 = vpop.eup %1364 }
 0x112   : > { %v568_v45 = vmul.f32 %v1968_v41, %v1968_v41  ;;  %v614_v46 = vmul.f32 0.7978846, %v602_v42  ;;  %v1367_v51 = vpop.eup %1366  ;;  %v635_v58 = vadd.f32 1.0, %v1365_v49 }
 0x113   : > { %v579_v47 = vmul.f32 %v567_v43, %v1965_v38  ;;  %1368 = vtanh.f32 %v613_v44  ;;  %v636_v63 = vadd.f32 1.0, %v1367_v51 }
 0x114   : > { %v580_v48 = vmul.f32 %v568_v45, %v1968_v41  ;;  %1370 = vtanh.f32 %v614_v46  ;;  %v647_v12 = vmul.f32 %v635_v58, %v551_v62 }
 0x115   : > { %v591_v50 = vmul.f32 0.044715, %v579_v47  ;;  %v648_v14 = vmul.f32 %v636_v63, %v552_v4 }
 0x116   : > { %v592_v52 = vmul.f32 0.044715, %v580_v48  ;;  %v519_v53 = vpop.f32.mrf.mxu0  ;;  %v555_v48 = vmul.f32 0.5, %v1965_v38 }
 0x117   : > { %v1977_v54 = vadd.f32 %v519_v53, %v1954_v9  ;;  %v543_v55 = vpop.f32.mrf.mxu1  ;;  %v603_v56 = vadd.f32 %v591_v50, %v1965_v38 }
 0x118   : > { %v1981_v57 = vadd.f32 %v543_v55, %v1956_v10  ;;  %v604_v59 = vadd.f32 %v592_v52, %v1968_v41 }
 0x119   : > { %v1369_v60 = vpop.eup %1368  ;;  %v569_v61 = vmul.f32 %v1977_v54, %v1977_v54  ;;  %v615_v8 = vmul.f32 0.7978846, %v603_v56  ;;  %v557_v52 = vmul.f32 0.5, %v1977_v54 }
 0x11a   : > { %v1371_v0 = vpop.eup %1370  ;;  %v570_v1 = vmul.f32 %v1981_v57, %v1981_v57  ;;  %v637_v3 = vadd.f32 1.0, %v1369_v60  ;;  %v616_v15 = vmul.f32 0.7978846, %v604_v59  ;;  %v558_v56 = vmul.f32 0.5, %v1981_v57 }
 0x11b   : > { %v581_v5 = vmul.f32 %v569_v61, %v1977_v54  ;;  %v638_v7 = vadd.f32 1.0, %v1371_v0  ;;  %1372 = vtanh.f32 %v615_v8 }
 0x11c   : > { %v582_v11 = vmul.f32 %v570_v1, %v1981_v57  ;;  %v649_v13 = vmul.f32 %v637_v3, %v553_v2  ;;  %1374 = vtanh.f32 %v616_v15 }
 0x11d   : > { %v593_v17 = vmul.f32 0.044715, %v581_v5  ;;  %v650_v18 = vmul.f32 %v638_v7, %v554_v6 }
 0x11e   : > { %v594_v19 = vmul.f32 0.044715, %v582_v11  ;;  %v522_v20 = vpop.f32.mrf.mxu0  ;;  %v665_v21 = vpack.c.bf16 %v649_v13, %v647_v12 }
 0x11f   : > { %v1991_v22 = vadd.f32 %v522_v20, %v1954_v9  ;;  %v546_v16 = vpop.f32.mrf.mxu1  ;;  %v666_v23 = vpack.c.bf16 %v650_v18, %v648_v14  ;;  %v605_v24 = vadd.f32 %v593_v17, %v1977_v54 }
 0x120   : > { %v1995_v25 = vadd.f32 %v546_v16, %v1956_v10  ;;  %807 = vmatmul.bf16.vlgmr.msra.gmra.mxu2 %v665_v21  ;;  %v606_v26 = vadd.f32 %v594_v19, %v1981_v57 }
 0x121   : > { %v571_v27 = vmul.f32 %v1991_v22, %v1991_v22  ;;  %831 = vmatmul.bf16.vlgmr.msra.gmra.mxu3 %v666_v23  ;;  %v617_v28 = vmul.f32 0.7978846, %v605_v24  ;;  %v1373_v33 = vpop.eup %1372  ;;  %v559_v13 = vmul.f32 0.5, %v1991_v22 }
 0x122   : > { %v572_v29 = vmul.f32 %v1995_v25, %v1995_v25  ;;  %v618_v30 = vmul.f32 0.7978846, %v606_v26  ;;  %v1375_v35 = vpop.eup %1374  ;;  %v639_v44 = vadd.f32 1.0, %v1373_v33  ;;  %v560_v14 = vmul.f32 0.5, %v1995_v25 }
 0x123   : > { %v583_v31 = vmul.f32 %v571_v27, %v1991_v22  ;;  %1376 = vtanh.f32 %v617_v28  ;;  %v640_v49 = vadd.f32 1.0, %v1375_v35  ;;  %v659_v28 = vld [vmem:[#allocation2 + $0x28] sm:$0xff] }
 0x124   : > { %v584_v32 = vmul.f32 %v572_v29, %v1995_v25  ;;  %1378 = vtanh.f32 %v618_v30  ;;  %v651_v60 = vmul.f32 %v639_v44, %v555_v48  ;;  %v663_v48 = vld [vmem:[#allocation2 + $0x18] sm:$0xff] }
 0x125   : > { %v595_v34 = vmul.f32 0.044715, %v583_v31 }
 0x126   : > { %v596_v36 = vmul.f32 0.044715, %v584_v32  ;;  %v524_v37 = vpop.f32.mrf.mxu0  ;;  %v660_v32 = vld [vmem:[#allocation2 + $0x10] sm:$0xff] }
 0x127   : > { %v525_v39 = vadd.f32 %v524_v37, %v1954_v9  ;;  %v548_v40 = vpop.f32.mrf.mxu1  ;;  %v607_v42 = vadd.f32 %v595_v34, %v1991_v22  ;;  %v556_v9 = vmul.f32 0.5, %v1968_v41 }
 0x128   : > { %v549_v43 = vadd.f32 %v548_v40, %v1956_v10  ;;  %v608_v45 = vadd.f32 %v596_v36, %v1995_v25  ;;  %v661_v36 = vld [vmem:[#allocation2 + $0x8] sm:$0xff] }
 0x129   : > { %v1377_v46 = vpop.eup %1376  ;;  %v573_v47 = vmul.f32 %v525_v39, %v525_v39  ;;  %v619_v10 = vmul.f32 0.7978846, %v607_v42  ;;  %v652_v0 = vmul.f32 %v640_v49, %v556_v9  ;;  %v561_v15 = vmul.f32 0.5, %v525_v39 }
 0x12a   : > { %v1379_v50 = vpop.eup %1378  ;;  %v574_v51 = vmul.f32 %v549_v43, %v549_v43  ;;  %v641_v53 = vadd.f32 1.0, %v1377_v46  ;;  %v620_v62 = vmul.f32 0.7978846, %v608_v45  ;;  %v562_v18 = vmul.f32 0.5, %v549_v43 }
 0x12b   : > { %v585_v55 = vmul.f32 %v573_v47, %v525_v39  ;;  %v642_v58 = vadd.f32 1.0, %v1379_v50  ;;  %1380 = vtanh.f32 %v619_v10 }
 0x12c   : > { %v586_v59 = vmul.f32 %v574_v51, %v549_v43  ;;  %v653_v61 = vmul.f32 %v641_v53, %v557_v52  ;;  %1382 = vtanh.f32 %v620_v62  ;;  %v664_v53 = vld [vmem:[#allocation2 + $0x20] sm:$0xff] }
 0x12d   : > { %v597_v63 = vmul.f32 0.044715, %v585_v55  ;;  %v654_v38 = vmul.f32 %v642_v58, %v558_v56 }
 0x12e   : > { %v598_v1 = vmul.f32 0.044715, %v586_v59  ;;  %v667_v2 = vpack.c.bf16 %v653_v61, %v651_v60 }
 0x12f   : > { %v668_v3 = vpack.c.bf16 %v654_v38, %v652_v0  ;;  %v609_v4 = vadd.f32 %v597_v63, %v525_v39 }
 0x130   : > { %812 = vmatmul.bf16.gmra.mxu2 %v667_v2  ;;  %v610_v54 = vadd.f32 %v598_v1, %v549_v43  ;;  %v662_v43 = vld [vmem:[#allocation2] sm:$0xff] }
 0x131   : > { %836 = vmatmul.bf16.gmra.mxu3 %v668_v3  ;;  %v621_v41 = vmul.f32 0.7978846, %v609_v4  ;;  %v1381_v5 = vpop.eup %1380 }
 0x132   : > { %v622_v57 = vmul.f32 0.7978846, %v610_v54  ;;  %v1383_v6 = vpop.eup %1382  ;;  %v643_v7 = vadd.f32 1.0, %v1381_v5 }
 0x133   : > { %1384 = vtanh.f32 %v621_v41  ;;  %v644_v11 = vadd.f32 1.0, %v1383_v6 }
 0x134   : > { %1386 = vtanh.f32 %v622_v57  ;;  %v655_v20 = vmul.f32 %v643_v7, %v559_v13 }
 0x135   : > { %v656_v16 = vmul.f32 %v644_v11, %v560_v14 }
 0x139   : > { %v1385_v8 = vpop.eup %1384 }
 0x13a   : > { %v1387_v12 = vpop.eup %1386  ;;  %v645_v17 = vadd.f32 1.0, %v1385_v8 }
 0x13b   : > { %v646_v19 = vadd.f32 1.0, %v1387_v12 }
 0x13c   : > { %v657_v21 = vmul.f32 %v645_v17, %v561_v15 }
 0x13d   : > { %v658_v23 = vmul.f32 %v646_v19, %v562_v18 }
 0x13e   : > { %v669_v24 = vpack.c.bf16 %v657_v21, %v655_v20 }
 0x13f   : > { %v670_v26 = vpack.c.bf16 %v658_v23, %v656_v16 }
 0x140   : > { %817 = vmatmul.bf16.gmra.mxu2 %v669_v24 }
 0x141   : > { %841 = vmatmul.bf16.gmra.mxu3 %v670_v26 }
 0x1a3   : > { %v808_v27 = vpop.f32.mrf.mxu2 }
 0x1a4   : > { %v832_v29 = vpop.f32.mrf.mxu3 }
 0x1a5   : > { %v833_v30 = vadd.f32 %v832_v29, %v808_v27 }
 0x1a7   : > { %v847_v31 = vadd.f32 %v833_v30, %v659_v28 }
 0x1a9   : > { %853 = vst [vmem:[#allocation2 + $0x28] sm:$0xff] %v847_v31 }
 0x1ab   : > { %v810_v22 = vpop.f32.mrf.mxu2 }
 0x1ac   : > { %v834_v33 = vpop.f32.mrf.mxu3 }
 0x1ad   : > { %v835_v25 = vadd.f32 %v834_v33, %v810_v22 }
 0x1af   : > { %v848_v34 = vadd.f32 %v835_v25, %v660_v32 }
 0x1b1   : > { %854 = vst [vmem:[#allocation2 + $0x10] sm:$0xff] %v848_v34 }
 0x1b3   : > { %v813_v35 = vpop.f32.mrf.mxu2 }
 0x1b4   : > { %v837_v37 = vpop.f32.mrf.mxu3 }
 0x1b5   : > { %v838_v39 = vadd.f32 %v837_v37, %v813_v35 }
 0x1b7   : > { %v849_v40 = vadd.f32 %v838_v39, %v661_v36 }
 0x1b9   : > { %855 = vst [vmem:[#allocation2 + $0x8] sm:$0xff] %v849_v40 }
 0x1bb   : > { %v815_v42 = vpop.f32.mrf.mxu2 }
 0x1bc   : > { %v839_v44 = vpop.f32.mrf.mxu3 }
 0x1bd   : > { %v840_v45 = vadd.f32 %v839_v44, %v815_v42 }
 0x1bf   : > { %v850_v46 = vadd.f32 %v840_v45, %v662_v43 }
 0x1c1   : > { %856 = vst [vmem:[#allocation2] sm:$0xff] %v850_v46 }
 0x1c3   : > { %v818_v47 = vpop.f32.mrf.mxu2 }
 0x1c4   : > { %v842_v49 = vpop.f32.mrf.mxu3 }
 0x1c5   : > { %v843_v50 = vadd.f32 %v842_v49, %v818_v47 }
 0x1c7   : > { %v851_v51 = vadd.f32 %v843_v50, %v663_v48 }
 0x1c9   : > { %857 = vst [vmem:[#allocation2 + $0x18] sm:$0xff] %v851_v51 }
 0x1cb   : > { %v820_v52 = vpop.f32.mrf.mxu2 }
 0x1cc   : > { %v844_v9 = vpop.f32.mrf.mxu3 }
 0x1cd   : > { %v845_v55 = vadd.f32 %v844_v9, %v820_v52  ;;  %862 = sbr.rel (%p1197_p5) target bundleno = 476 (0x1dc), region = 64 }
 0x1cf   : > { %v852_v56 = vadd.f32 %v845_v55, %v664_v53 }
 0x1d1   : > { %858 = vst [vmem:[#allocation2 + $0x20] sm:$0xff] %v852_v56 }
 0x1d2   : > { %v863_v58 = vld [vmem:[#allocation2 + $0x28] sm:$0xff]  ;;  %v1388_v10 = vld [vmem:[%s2081_s4] ss:$0 sm:$0xff]  ;;  %v864_v59 = vld [vmem:[#allocation2 + $0x10] sm:$0xff] }
 0x1d3   : > { %v865_v60 = vld [vmem:[#allocation2 + $0x8] sm:$0xff]  ;;  %v866_v61 = vld [vmem:[#allocation2] sm:$0xff]  ;;  %v873_v62 = vadd.f32 %v1388_v10, %v863_v58  ;;  %v874_v63 = vadd.f32 %v1388_v10, %v864_v59  ;;  %v867_v38 = vld [vmem:[#allocation2 + $0x18] sm:$0xff] }
 0x1d4   : > { %v875_v0 = vadd.f32 %v1388_v10, %v865_v60  ;;  %v876_v2 = vadd.f32 %v1388_v10, %v866_v61  ;;  %v877_v3 = vadd.f32 %v1388_v10, %v867_v38 }
 0x1d5   : > { %879 = vst [vmem:[%s1898_s30] sm:$0xff] %v873_v62 }
 0x1d6   : > { %880 = vst [vmem:[%s1898_s30 + $0x8] sm:$0xff] %v874_v63 }
 0x1d7   : > { %881 = vst [vmem:[%s1898_s30 + $0x10] sm:$0xff] %v875_v0 }
 0x1d8   : > { %v868_v1 = vld [vmem:[#allocation2 + $0x20] sm:$0xff]  ;;  %882 = vst [vmem:[%s1898_s30 + $0x18] sm:$0xff] %v876_v2 }
 0x1d9   : > { %v878_v4 = vadd.f32 %v1388_v10, %v868_v1  ;;  %883 = vst [vmem:[%s1898_s30 + $0x20] sm:$0xff] %v877_v3 }
 0x1db   : > { %884 = vst [vmem:[%s1898_s30 + $0x28] sm:$0xff] %v878_v4 }
 0x1dc PF: > { %s2128_s24 = sld [smem:[#allocation19_spill]]  ;;  %s898_s21 = sshll.u32 %s1898_s30, 4  ;;  %s899_s21 = int_to_ptr.vmem [resolvable:$true] %s898_s21 }
 0x1dd   : > { %s2130_s28 = sld [smem:[#allocation30_spill]]  ;;  %s886_s12 = scalar_lea.sflag [#allocation5], %s1872_s16 }
 0x1e2   : > { %s1236_s20 = smul.u32 48, %s2128_s24 }
 0x1e3   : > { %s2131_s14 = smov %s2130_s28 }
 0x1e4   : > { %s897_s8 = scalar_lea.hbm %s2130_s28, %s1236_s20  ;;  %s1529_s10 = scalar_lea.hbm %s2131_s14, 96 }
 0x1e5   : > { %s900_s1 = sshll.u32 %s897_s8, 4  ;;  %s901_s1 = int_to_ptr.hbm [resolvable:$true] %s900_s1 }
 0x1e6   : > { %s1523_s9 = sshra.s32 %s901_s1, 4  ;;  %s1524_s9 = int_to_ptr.hbm [resolvable:$true] %s1523_s9 }
 0x1e7   : > { %s1525_s0 = scalar_lea.hbm %s1524_s9, 48  ;;  %p1530_p12 = scmp.lt.s32.totalorder %s1524_s9, %s2131_s14 }
 0x1e8   : > { %p1526_p8 = scmp.ne.s32.totalorder %s1524_s9, %s1525_s0  ;;  %p1531_p4 = scmp.lt.s32.totalorder %s1529_s10, %s1525_s0 }
 0x1ea   : > { %p1527_p10 = pnand %p1526_p8, %p1830_p1  ;;  %p1532_p0 = por %p1531_p4, %p1530_p12 }
 0x1ec   : > { %p1528_p11 = pneg %p1527_p10 }
 0x1ee   : > { %p1533_p7 = pnand %p1532_p0, %p1528_p11 }
 0x1f0   : > { %1536 = shalt.err (!%p1533_p7)
}
 0x1f1   : > { %s1647_s16 = smov 128   ;;  %s1648_s18 = smov 8  }
 0x1f2   : > { %1247 = dma.vmem_to_hbm [thread:$0]  (%p1830_p1), %s899_s21, 768, %s901_s1, %s886_s12, %s1647_s16, %s1647_s16, %s1648_s18  }
 0x1f3 PF: > { %s2132_s17 = sld [smem:[#allocation21_spill]] }
 0x1f4   : > { %s2133_s25 = sld [smem:[#allocation17_spill]] }
 0x1f9   : > { %p1267_p9 = scmp.ge.s32.totalorder %s2132_s17, 2 }
 0x1fa   : > { %s915_s5 = sand.u32 1, %s2133_s25  }
 0x1fb   : > { %p1263_p2 = pnand %p1267_p9, %p1837_p6  ;;  %s916_s13 = scalar_lea.sflag [#allocation5], %s915_s5 }
 0x1fd   : > { %p1264_p13 = pneg %p1263_p2 }
 0x1ff   : > { %1594 = dma.done.wait (%p1264_p13), %s916_s13, 768  }
 0x200   : > { %1596 = vsyncadd (%p1264_p13), %s916_s13, 4294966528  ;;  %s27_s28 = sadd.s32 1, %s2132_s17   ;;  %s2135_s24 = sld [smem:[#allocation16_spill]] }
 0x201   : > { %p24_p3 = scmp.ge.s32.totalorder %s27_s28, 6   ;;  %s2136_s20 = sld [smem:[#allocation24_spill]] }
 0x202   : > { %s2137_s29 = sld [smem:[#allocation18_spill]]  ;;  %s2142_s18 = smov %s1603_s19 }
 0x203   : > { %s2138_s23 = sld [smem:[#allocation25_spill]]  ;;  %s2144_s21 = smov %s1615_s22 }
 0x204   : > { %s2139_s25 = sld [smem:[#allocation20_spill]] }
 0x205   : > { %s2140_s27 = sld [smem:[#allocation22_spill]] }
 0x206   : > { %s2141_s8 = sld [smem:[#allocation23_spill]]  ;;  %s2143_s19 = smov %s2135_s24 }
 0x207   : > { %s2146_s24 = smov %s1631_s26 }
 0x208   : > { %s2145_s22 = smov %s2137_s29  ;;  %26 = sbr.rel (!%p24_p3) target bundleno = 17 (0x11), region = 130 }
 0x20b   : > { %s2147_s26 = smov %s2140_s27 }
 0x20c   : > { %s2148_s27 = smov %s2141_s8 }
 0x20d   :  { %922 = vsyncpa [#allocation4], 1 }
 0x20e   :  { %924 = vsyncpa [#allocation4 + $0x1], 1 }
 0x20f   :  { %925 = vsyncpa [#allocation7], 1 }
 0x210   :  { %927 = vsyncpa [#allocation7 + $0x1], 1 }
 0x211   :  { %928 = vsyncpa [#allocation10], 1 }
 0x212   :  { %930 = vsyncpa [#allocation10 + $0x1], 1 }
 0x213   :  { %931 = vsyncpa [#allocation5], 1 }
 0x214   :  { %933 = vsyncpa [#allocation5 + $0x1], 1 }

</bundles_post_ra>
